<compile_context>
chip_gen: v7x
topology: tpu7x:2x2x1
jax: 0.10.0
libtpu: 0.0.40
codegen_flags: <defaults>
</compile_context>

<pallas_src>
import functools

import jax
import jax.numpy as jnp
from jax.experimental import pallas as pl
from jax.experimental.pallas import tpu as pltpu


_VMEM_LIMIT_BYTES = 32 * 1024 * 1024          # headroom; safe on v5e/v6e/v7x
_TARGET_BLOCK_BYTES = 2 * 1024 * 1024         # ~2 MiB per buffer (amortizes step overhead)
_ROW_BUDGET_BYTES = 8 * 1024 * 1024           # switch to two-pass above this per-row-block size


# ---------------------------------------------------------------------------
# Kernels
# ---------------------------------------------------------------------------

def _peak_normalize_block_kernel(x_ref, o_ref, *, eps):
    """Single-pass: whole time axis resident per block.

    x_ref, o_ref: (TB, T) VMEM tiles.
    """
    x = x_ref[...]
    a = jnp.abs(x).astype(jnp.float32)
    peak = jnp.max(a, axis=-1, keepdims=True)              # (TB, 1) lane reduction (XLU)
    inv = pl.reciprocal(jnp.maximum(peak, eps), approx=False)  # tiny (TB, 1); exactness matters
    o_ref[...] = (x.astype(jnp.float32) * inv).astype(o_ref.dtype)  # VPU elementwise


def _row_peak_kernel(x_ref, peak_ref, acc_ref, *, total_t, eps):
    """Two-pass, pass 1: running per-row |x| max over tiled time axis.

    x_ref: (TB, TT) tile, peak_ref: (TB, 1) output, acc_ref: (TB, 1) VMEM scratch.
    Grid axis 1 (time) is the reduction axis ("arbitrary").
    """
    k = pl.program_id(1)

    @pl.when(k == 0)
    def _():
        acc_ref[...] = jnp.zeros_like(acc_ref)

    x = x_ref[...]
    tt = x.shape[-1]
    # Mask the lane tail of the last (possibly partial) time tile.
    col = k * tt + jax.lax.broadcasted_iota(jnp.int32, x.shape, 1)
    a = jnp.where(col < total_t, jnp.abs(x).astype(jnp.float32), 0.0)
    acc_ref[...] = jnp.maximum(acc_ref[...], jnp.max(a, axis=-1, keepdims=True))

    @pl.when(k == pl.num_programs(1) - 1)
    def _():
        peak_ref[...] = jnp.maximum(acc_ref[...], eps)      # fold eps clamp into finalize


def _apply_peak_kernel(x_ref, denom_ref, o_ref):
    """Two-pass, pass 2: elementwise divide by the per-row peak."""
    inv = pl.reciprocal(denom_ref[...], approx=False)       # (TB, 1)
    o_ref[...] = (x_ref[...].astype(jnp.float32) * inv).astype(o_ref.dtype)


# ---------------------------------------------------------------------------
# Tile-size selection (respecting the (8, 128) tiling rule)
# ---------------------------------------------------------------------------

def _sanitize_rows(tb, B):
    tb = int(min(tb, B))
    if tb >= B:
        return B                      # full batch dim: exempt from the /8 rule
    tb = (tb // 8) * 8
    if tb < 8:
        tb = 8
    return B if tb >= B else tb


def _sanitize_cols(tt, T):
    tt = int(min(tt, T))
    if tt >= T:
        return T                      # full time dim: exempt from the /128 rule
    tt = (tt // 128) * 128
    if tt < 128:
        tt = 128
    return T if tt >= T else tt


def _pick_batch_tile(B, T, itemsize, target_bytes):
    row_bytes = T * itemsize
    return _sanitize_rows(max(1, target_bytes // row_bytes), B)


def _pick_time_tile(T, tb, itemsize, target_bytes):
    return _sanitize_cols(max(128, target_bytes // (tb * itemsize)), T)


# ---------------------------------------------------------------------------
# Wrappers around pallas_call
# ---------------------------------------------------------------------------

def _peak_normalize_single_pass(x, tb, eps):
    B, T = x.shape
    kernel = functools.partial(_peak_normalize_block_kernel, eps=eps)
    # NOTE: input_output_aliases={0: 0} is safe here (each element read once
    # within its own block) and halves peak HBM footprint, but is left off so
    # the caller's input buffer stays valid without requiring donation.
    return pl.pallas_call(
        kernel,
        out_shape=jax.ShapeDtypeStruct((B, T), x.dtype),
        grid_spec=pltpu.PrefetchScalarGridSpec(
            num_scalar_prefetch=0,
            grid=(pl.cdiv(B, tb),),
            in_specs=[pl.BlockSpec((tb, T), lambda i: (i, 0))],
            out_specs=pl.BlockSpec((tb, T), lambda i: (i, 0)),
        ),
        compiler_params=pltpu.CompilerParams(
            dimension_semantics=("parallel",),        # lets v7x shard across 2 TCs
            vmem_limit_bytes=_VMEM_LIMIT_BYTES,
        ),
    )(x)


def _peak_normalize_two_pass(x, tb, tt, eps):
    B, T = x.shape
    bg, tg = pl.cdiv(B, tb), pl.cdiv(T, tt)

    # Pass 1: per-row peak (time axis is the reduction axis -> "arbitrary").
    peak_kernel = functools.partial(_row_peak_kernel, total_t=T, eps=eps)
    denom = pl.pallas_call(
        peak_kernel,
        out_shape=jax.ShapeDtypeStruct((B, 1), jnp.float32),
        grid_spec=pltpu.PrefetchScalarGridSpec(
            num_scalar_prefetch=0,
            grid=(bg, tg),
            in_specs=[pl.BlockSpec((tb, tt), lambda i, k: (i, k))],
            out_specs=pl.BlockSpec((tb, 1), lambda i, k: (i, 0)),
            scratch_shapes=[pltpu.VMEM((tb, 1), jnp.float32)],
        ),
        compiler_params=pltpu.CompilerParams(
            dimension_semantics=("parallel", "arbitrary"),
            vmem_limit_bytes=_VMEM_LIMIT_BYTES,
        ),
    )(x)

    # Pass 2: fully parallel elementwise normalize.
    return pl.pallas_call(
        _apply_peak_kernel,
        out_shape=jax.ShapeDtypeStruct((B, T), x.dtype),
        grid_spec=pltpu.PrefetchScalarGridSpec(
            num_scalar_prefetch=0,
            grid=(bg, tg),
            in_specs=[pl.BlockSpec((tb, tt), lambda i, k: (i, k)),
                      pl.BlockSpec((tb, 1), lambda i, k: (i, 0))],
            out_specs=pl.BlockSpec((tb, tt), lambda i, k: (i, k)),
        ),
        compiler_params=pltpu.CompilerParams(
            dimension_semantics=("parallel", "parallel"),
            vmem_limit_bytes=_VMEM_LIMIT_BYTES,
        ),
    )(x, denom)


def peak_normalize(audio_data: jax.Array,
                   *,
                   eps: float = 1e-8,
                   block_rows: int | None = None,
                   block_cols: int | None = None) -> jax.Array:
    """Pallas-backed per-example peak normalization.  audio_data: (B, T) float."""
    B, T = audio_data.shape
    itemsize = jnp.dtype(audio_data.dtype).itemsize
    row_bytes = T * itemsize

    force_two_pass = block_cols is not None and block_cols < T
    too_long_for_single = min(B, 8) * row_bytes > _ROW_BUDGET_BYTES

    if not force_two_pass and not too_long_for_single:
        tb = (_sanitize_rows(block_rows, B) if block_rows is not None
              else _pick_batch_tile(B, T, itemsize, _TARGET_BLOCK_BYTES))
        return _peak_normalize_single_pass(audio_data, tb, eps)

    tb = (_sanitize_rows(block_rows, B) if block_rows is not None
          else _sanitize_rows(8, B))
    tt = (_sanitize_cols(block_cols, T) if block_cols is not None
          else _pick_time_tile(T, tb, itemsize, _TARGET_BLOCK_BYTES))
    return _peak_normalize_two_pass(audio_data, tb, tt, eps)


# ---------------------------------------------------------------------------
# FunctionalModule wrapper (the actual module being ported)
# ---------------------------------------------------------------------------

class FunctionalModule:
    """JAX/Pallas port of the PyTorch FunctionalModule wrapper.

    Composes an arbitrary preprocessing functional; forward() simply applies
    it to the input waveform.
    """

    def __init__(self, functional):
        # TODO(synk): FunctionalModule wraps an *arbitrary* user functional;
        # the Pallas kernel above (peak_normalize) is a concrete representative
        # choice since the module itself defines no compute.
        self.functional = functional

    def forward(self, audio_data: jax.Array) -> jax.Array:
        return self.functional(audio_data)

    __call__ = forward


if __name__ == "__main__":
    key = jax.random.PRNGKey(0)
    k1, k2, k3 = jax.random.split(key, 3)

    def ref_fn(x):
        peak = jnp.max(jnp.abs(x), axis=-1, keepdims=True)
        return x / jnp.maximum(peak, 1e-8)

    module = FunctionalModule(peak_normalize)

    # 1) Small waveform (matches the original spec): single block, grid=(1,).
    a1 = jax.random.normal(k1, (2, 2048), dtype=jnp.float32) * 3.0
    o1 = jax.block_until_ready(module(a1))
    assert o1.shape == a1.shape and o1.dtype == a1.dtype
    assert jnp.allclose(o1, ref_fn(a1), atol=1e-5, rtol=1e-5)
    assert jnp.all(jnp.abs(o1) <= 1.0 + 1e-5)

    # 2) Batch-tiled single-pass path (grid > 1, pipelined batch blocks).
    a2 = jax.random.normal(k2, (32, 1024), dtype=jnp.float32) * 2.0
    o2 = jax.block_until_ready(peak_normalize(a2, block_rows=8))
    assert jnp.allclose(o2, ref_fn(a2), atol=1e-5, rtol=1e-5)

    # 3) Two-pass long-row path, with a non-multiple-of-128 time length
    #    (exercises the masked lane tail in the running-max pass).
    a3 = jax.random.normal(k3, (4, 4096 + 64), dtype=jnp.float32) * 1.7
    o3 = jax.block_until_ready(peak_normalize(a3, block_cols=1024))
    assert jnp.allclose(o3, ref_fn(a3), atol=1e-5, rtol=1e-5)

    print("KERNEL_OK")
</pallas_src>

<mosaic_0001>
module attributes {stable_mosaic.version = 11 : i64} {
  func.func @_peak_normalize_block_kernel(%arg0: i32, %arg1: memref<2x2048xf32, #tpu.memory_space<vmem>>, %arg2: memref<2x2048xf32, #tpu.memory_space<vmem>>) attributes {dimension_semantics = [#tpu.dimension_semantics<parallel>], iteration_bounds = array<i64: 1>, scalar_prefetch = 0 : i64, scratch_operands = 0 : i64, tpu.core_type = #tpu.core_type<tc>, window_params = [{transform_indices = @transform_0, window_bounds = array<i64: 2, 2048>}, {transform_indices = @transform_1, window_bounds = array<i64: 2, 2048>}]} {
    %c0 = arith.constant 0 : index
    %c0_0 = arith.constant 0 : index
    %0 = vector.load %arg1[%c0, %c0_0] : memref<2x2048xf32, #tpu.memory_space<vmem>>, vector<2x2048xf32>
    %1 = math.absf %0 : vector<2x2048xf32>
    %cst = arith.constant dense<0xFF800000> : vector<2xf32>
    %2 = vector.multi_reduction <maximumf>, %1, %cst [1] : vector<2x2048xf32> to vector<2xf32>
    %3 = vector.shape_cast %2 : vector<2xf32> to vector<2x1xf32>
    %cst_1 = arith.constant 9.99999993E-9 : f32
    %4 = vector.broadcast %cst_1 : f32 to vector<2x1xf32>
    %5 = arith.maximumf %3, %4 : vector<2x1xf32>
    %6 = tpu.reciprocal %5 : vector<2x1xf32> -> vector<2x1xf32>
    %7 = vector.broadcast %6 : vector<2x1xf32> to vector<2x2048xf32>
    %8 = arith.mulf %0, %7 : vector<2x2048xf32>
    %c0_2 = arith.constant 0 : index
    %c0_3 = arith.constant 0 : index
    %9 = vector.load %arg2[%c0_2, %c0_3] : memref<2x2048xf32, #tpu.memory_space<vmem>>, vector<2x2048xf32>
    tpu.vector_store %arg2[%c0_2, %c0_3], %8 {strides = array<i32>} : memref<2x2048xf32, #tpu.memory_space<vmem>>, vector<2x2048xf32>,
    return
  }
  func.func @transform_0(%arg0: i32) -> (i32, i32) {
    %c0_i32 = arith.constant 0 : i32
    %c0_i32_0 = arith.constant 0 : i32
    return %arg0, %c0_i32 : i32, i32
  }
  func.func @transform_1(%arg0: i32) -> (i32, i32) {
    %c0_i32 = arith.constant 0 : i32
    %c0_i32_0 = arith.constant 0 : i32
    return %arg0, %c0_i32 : i32, i32
  }
}

</mosaic_0001>

<bundles_post_ra>
// kernel: tpu_custom_call.1
= control target key start
LH: loop header
LB: loop body
LE: loop exit
PB: predicated region body
PF: predicated region fallthrough
CT: control target
= control target key end

     0   :  { %6 = vsyncpa [#allocation3], 0  ;;  %s313_s0 = inlined_call_operand.hbm [shape: f32[2,2048], index: 0, kind: input, shape index: {}]   ;;  %s314_s1 = inlined_call_operand.hbm [shape: f32[2,2048], index: 1, kind: output, shape index: {}]  }
   0x1   :  { %7 = vsyncpa [#allocation4], 0  ;;  %s239_s6 = smov [#allocation2]   ;;  %s191_s10 = scalar_lea.hbm %s313_s0, 512 }
   0x2   :  { %s14_s7 = sshll.u32 %s239_s6, 4  ;;  %p192_p0 = scmp.ne.s32.totalorder %s313_s0, %s191_s10  ;;  %s15_s7 = int_to_ptr.vmem [resolvable:$true] %s14_s7 }
   0x3   :  { %p195_p1 = scmp.lt.u32.totalorder %s191_s10, %s313_s0 }
   0x5   :  { %p197_p2 = pnand %p195_p1, %p192_p0 }
   0x7   :  { %200 = shalt.err (!%p197_p2)
}
   0x8   :  { %s201_s15 = scalar_lea.vmem %s15_s7, 512  ;;  %p206_p4 = scmp.lt.s32.totalorder %s15_s7, %s15_s7 }
   0x9   :  { %p202_p3 = scmp.ne.s32.totalorder %s15_s7, %s201_s15  ;;  %p207_p5 = scmp.lt.s32.totalorder %s201_s15, %s201_s15 }
   0xb   :  { %p208_p6 = por %p207_p5, %p206_p4 }
   0xd   :  { %p209_p7 = pnand %p208_p6, %p202_p3 }
   0xf   :  { %212 = shalt.err (!%p209_p7)
}
  0x10   :  { %17 = dma.hbm_to_vmem [thread:$0]  %s313_s0, 512, %s15_s7, [#allocation3]  }
  0x11   :  { %235 = dma.done.wait [#allocation3], 512  }
  0x12   :  { %236 = vsyncadd [#allocation3], 4294966784  ;;  %v37_v0 = vlaneseq  ;;  %v240_v1 = vmov 1983009808   ;;  %v268_v6 = vld [vmem:[#allocation2] sm:$0xff]  ;;  %v270_v7 = vld [vmem:[#allocation2 + $0x8] sm:$0xff] }
  0x13   :  { %v35_v2 = vunpack.c.l.s4 %v240_v1  ;;  %v272_v8 = vld [vmem:[#allocation2 + $0x10] sm:$0xff]  ;;  %v274_v9 = vld [vmem:[#allocation2 + $0x18] sm:$0xff]  ;;  %v25_v10 = vand.u32 2147483647, %v268_v6  ;;  %v26_v11 = vand.u32 2147483647, %v270_v7 }
  0x14   :  { %v265_v3 = vshrl.u32 %v37_v0, 7  ;;  %v27_v12 = vand.u32 2147483647, %v272_v8  ;;  %v28_v13 = vand.u32 2147483647, %v274_v9  ;;  %vm117_vm0 = vcmask 1041408  }
  0x15   :  { %v36_v4 = vunpack.c.0.s8 %v35_v2  ;;  %v33_v14 = vcombine.high %v25_v10, %v25_v10  ;;  %v50_v16 = vcombine.high %v26_v11, %v26_v11  ;;  %s242_s0 = smov [#allocation5]  }
  0x16   :  { %v67_v18 = vcombine.high %v27_v12, %v27_v12  ;;  %v84_v20 = vcombine.high %v28_v13, %v28_v13  ;;  %s176_s18 = sshll.u32 %s242_s0, 4  ;;  %s177_s18 = int_to_ptr.vmem [resolvable:$true] %s176_s18 }
  0x17   :  { %v39_v5 = vsub.s32 %v36_v4, %v265_v3  ;;  %v241_v4 = vmov 269488144   ;;  %s213_s19 = scalar_lea.vmem %s177_s18, 512  ;;  %p218_p9 = scmp.lt.s32.totalorder %s177_s18, %s177_s18 }
  0x18   :  { %p214_p8 = scmp.ne.s32.totalorder %s177_s18, %s213_s19  ;;  %p219_p10 = scmp.lt.s32.totalorder %s213_s19, %s213_s19 }
  0x19   :  { %v40_v15 = vrot.slane %v25_v10, %v39_v5  ;;  %v57_v17 = vrot.slane %v26_v11, %v39_v5  ;;  %v74_v19 = vrot.slane %v27_v12, %v39_v5  ;;  %v91_v21 = vrot.slane %v28_v13, %v39_v5 }
  0x1a   :  { %v47_v22 = vrot.slane %v33_v14, %v39_v5  ;;  %v64_v24 = vrot.slane %v50_v16, %v39_v5  ;;  %v81_v26 = vrot.slane %v67_v18, %v39_v5  ;;  %v98_v28 = vrot.slane %v84_v20, %v39_v5  ;;  %p220_p11 = por %p219_p10, %p218_p9 }
  0x1b   :  { %v48_v23 = vcombine.high %v40_v15, %v40_v15  ;;  %v65_v25 = vcombine.high %v57_v17, %v57_v17  ;;  %v82_v27 = vcombine.high %v74_v19, %v74_v19  ;;  %v99_v29 = vcombine.high %v91_v21, %v91_v21 }
  0x1c   :  { %v49_v30 = vcombine.high %v47_v22, %v47_v22  ;;  %v66_v31 = vcombine.high %v64_v24, %v64_v24  ;;  %v118_v32 = vsel %vm117_vm0, %v40_v15, -inf  ;;  %v83_v34 = vcombine.high %v81_v26, %v81_v26  ;;  %p221_p12 = pnand %p220_p11, %p214_p8 }
  0x1d   :  { %v119_v33 = vsel %vm117_vm0, %v48_v23, -inf  ;;  %v100_v35 = vcombine.high %v98_v28, %v98_v28  ;;  %v120_v36 = vsel %vm117_vm0, %v47_v22, -inf  ;;  %v122_v37 = vsel %vm117_vm0, %v57_v17, -inf }
  0x1e   :  { %v121_v38 = vsel %vm117_vm0, %v49_v30, -inf  ;;  %v123_v39 = vmax.f32 %v118_v32, %v122_v37  ;;  %v124_v40 = vsel %vm117_vm0, %v65_v25, -inf  ;;  %v126_v41 = vsel %vm117_vm0, %v64_v24, -inf }
  0x1f   :  { %v125_v42 = vmax.f32 %v119_v33, %v124_v40  ;;  %v127_v43 = vmax.f32 %v120_v36, %v126_v41  ;;  %v128_v44 = vsel %vm117_vm0, %v66_v31, -inf  ;;  %v130_v45 = vsel %vm117_vm0, %v74_v19, -inf }
  0x20   :  { %v129_v46 = vmax.f32 %v121_v38, %v128_v44  ;;  %v131_v47 = vmax.f32 %v123_v39, %v130_v45  ;;  %v132_v48 = vsel %vm117_vm0, %v82_v27, -inf  ;;  %v134_v49 = vsel %vm117_vm0, %v81_v26, -inf }
  0x21   :  { %v133_v50 = vmax.f32 %v125_v42, %v132_v48  ;;  %v135_v51 = vmax.f32 %v127_v43, %v134_v49  ;;  %v136_v52 = vsel %vm117_vm0, %v83_v34, -inf  ;;  %v138_v53 = vsel %vm117_vm0, %v91_v21, -inf }
  0x22   :  { %v137_v54 = vmax.f32 %v129_v46, %v136_v52  ;;  %v139_v55 = vmax.f32 %v131_v47, %v138_v53  ;;  %v140_v56 = vsel %vm117_vm0, %v99_v29, -inf  ;;  %v142_v57 = vsel %vm117_vm0, %v98_v28, -inf }
  0x23   :  { %v141_v58 = vmax.f32 %v133_v50, %v140_v56  ;;  %v143_v59 = vmax.f32 %v135_v51, %v142_v57  ;;  %v144_v60 = vsel %vm117_vm0, %v100_v35, -inf  ;;  %v155_v5 = vunpack.c.l.s4 %v241_v4 }
  0x24   :  { %v145_v61 = vmax.f32 %v137_v54, %v144_v60 }
  0x25   :  { %v146_v62 = vmax.f32 %v139_v55, %v141_v58  ;;  %v156_v10 = vunpack.c.0.s8 %v155_v5 }
  0x26   :  { %v147_v63 = vmax.f32 %v143_v59, %v145_v61 }
  0x27   :  { %v159_v11 = vsub.s32 %v156_v10, %v265_v3 }
  0x28   :  { %v148_v0 = vmax.f32 %v146_v62, %v147_v63 }
  0x2a   :  { %149 = vmax.xlane.f32.xlu0 %v148_v0 }
  0xb7   :  { %v150_v1 = vpop.xlane.xlu0 %149 }
  0xb8   :  { %v151_v2 = vmax.f32 %v150_v1, 1e-08 }
  0xba   :  { %189 = vrcp.f32 %v151_v2 }
  0xc4   :  { %v190_v12 = vpop.eup %189 }
  0xc5   :  { %v160_v13 = vrot.slane %v190_v12, %v159_v11 }
  0xc7   :  { %v162_v14 = vmul.f32 %v160_v13, %v268_v6  ;;  %v163_v15 = vmul.f32 %v160_v13, %v270_v7  ;;  %v164_v16 = vmul.f32 %v160_v13, %v272_v8  ;;  %v165_v17 = vmul.f32 %v160_v13, %v274_v9 }
  0xc9   :  { %166 = vst [vmem:[#allocation5] sm:$0xff] %v162_v14  ;;  %167 = vst [vmem:[#allocation5 + $0x8] sm:$0xff] %v163_v15 }
  0xca   :  { %168 = vst [vmem:[#allocation5 + $0x10] sm:$0xff] %v164_v16  ;;  %169 = vst [vmem:[#allocation5 + $0x18] sm:$0xff] %v165_v17 }
  0xcb   :  { %224 = shalt.err (!%p221_p12)
}
  0xcc   :  { %s225_s22 = scalar_lea.hbm %s314_s1, 512 }
  0xcd   :  { %p226_p13 = scmp.ne.s32.totalorder %s314_s1, %s225_s22  ;;  %p229_p0 = scmp.lt.u32.totalorder %s225_s22, %s314_s1 }
  0xcf   :  { %p231_p1 = pnand %p229_p0, %p226_p13 }
  0xd1   :  { %234 = shalt.err (!%p231_p1)
}
  0xd2   :  { %179 = dma.vmem_to_hbm [thread:$0]  %s177_s18, 512, %s314_s1, [#allocation4]  }
  0xd3   :  { %237 = dma.done.wait [#allocation4], 512  }
  0xd4   :  { %238 = vsyncadd [#allocation4], 4294966784 }
  0xd5   :  { %183 = vsyncpa [#allocation3], 1 }
  0xd6   :  { %184 = vsyncpa [#allocation4], 1 }

</bundles_post_ra>
